<compile_context>
chip_gen: v7x
topology: tpu7x:2x2x1
jax: 0.10.0
libtpu: 0.0.40
codegen_flags: <defaults>
</compile_context>

<pallas_src>
import jax
import jax.numpy as jnp
from jax.experimental import pallas as pl
from jax.experimental.pallas import tpu as pltpu

_MASK_BIAS = 1e9  # magnitude of the additive bias applied to padded keys


def _softmax(x, axis, approx):
    m = jnp.max(x, axis=axis, keepdims=True)
    e = jnp.exp(x - m)
    s = jnp.sum(e, axis=axis, keepdims=True)
    return e * pl.reciprocal(s, approx=approx)


def _make_full_kernel(approx_recip):
    """Query tile == full S: single shared input block.  Dot-product
    similarity is symmetric, so the b->a scores are the transpose of the a->b
    scores; we softmax along axis=-2 with a column bias and transpose only the
    value-dtype probabilities (no f32 SxS relayout, one QK^T matmul total)."""

    def kernel(h_ref, bias_row_ref, bias_col_ref, o_ref):
        h = h_ref[...]                        # (P, 2, S, H) native dtype
        a = h[:, 0]                           # (P, S, H)
        b = h[:, 1]
        bias_b = bias_row_ref[...][:, 1]      # (P, 1, S) f32: mask of b's keys
        bias_a = bias_col_ref[...][:, 0]      # (P, S, 1) f32: mask of a's keys

        # One QK^T for both directions; f32 accumulation on the MXU.
        sim = jnp.einsum("pqd,pkd->pqk", a, b,
                         preferred_element_type=jnp.float32)   # (P, S, S)

        # a -> b: softmax over b's keys (last axis), additive row bias.
        p_ab = _softmax(sim + bias_b, -1, approx_recip).astype(b.dtype)
        # b -> a: sim_ba = sim^T, so softmax over a's keys == axis=-2 of sim
        # with a column bias; transpose the (cheaper) value-dtype probs.
        p_ba_t = _softmax(sim + bias_a, -2, approx_recip).astype(a.dtype)
        p_ba = jnp.swapaxes(p_ba_t, -1, -2)

        att_a = jnp.einsum("pqk,pkd->pqd", p_ab, b,
                           preferred_element_type=jnp.float32)
        att_b = jnp.einsum("pqk,pkd->pqd", p_ba, a,
                           preferred_element_type=jnp.float32)

        # Residual in f32; two direct stores (no jnp.stack relayout).
        o_ref[:, 0, :, :] = (a.astype(jnp.float32) + att_a).astype(o_ref.dtype)
        o_ref[:, 1, :, :] = (b.astype(jnp.float32) + att_b).astype(o_ref.dtype)

    return kernel


def _make_tiled_kernel(tq, approx_recip):
    """Query-tiled path: the query tile is sliced out of the resident full-S
    pair block, so there is no second double-buffered input stream."""

    def kernel(h_ref, bias_ref, o_ref):
        q0 = pl.multiple_of(pl.program_id(1) * tq, tq)
        hq = h_ref[:, :, pl.ds(q0, tq), :]    # (P, 2, tq, H) query tile
        h = h_ref[...]                        # (P, 2, S,  H) full keys
        a_q, b_q = hq[:, 0], hq[:, 1]
        a_k, b_k = h[:, 0], h[:, 1]
        bias = bias_ref[...]                  # (P, 2, 1, S) f32
        bias_a, bias_b = bias[:, 0], bias[:, 1]

        sim_ab = jnp.einsum("pqd,pkd->pqk", a_q, b_k,
                            preferred_element_type=jnp.float32) + bias_b
        sim_ba = jnp.einsum("pqd,pkd->pqk", b_q, a_k,
                            preferred_element_type=jnp.float32) + bias_a

        p_ab = _softmax(sim_ab, -1, approx_recip).astype(b_k.dtype)
        p_ba = _softmax(sim_ba, -1, approx_recip).astype(a_k.dtype)

        att_a = jnp.einsum("pqk,pkd->pqd", p_ab, b_k,
                           preferred_element_type=jnp.float32)
        att_b = jnp.einsum("pqk,pkd->pqd", p_ba, a_k,
                           preferred_element_type=jnp.float32)

        o_ref[:, 0, :, :] = (a_q.astype(jnp.float32) + att_a).astype(o_ref.dtype)
        o_ref[:, 1, :, :] = (b_q.astype(jnp.float32) + att_b).astype(o_ref.dtype)

    return kernel


def _tpu_generation_info():
    """Returns (vmem_capacity_bytes, tensorcores_per_chip) with conservative
    fallbacks if the queries are unavailable."""
    vmem_cap = None
    try:
        vmem_cap = int(pltpu.get_tpu_info().vmem_capacity_bytes)
    except Exception:
        pass
    kind = ""
    try:
        kind = jax.devices()[0].device_kind.lower()
    except Exception:
        pass
    if vmem_cap is None:
        vmem_cap = 64 * 1024 * 1024          # smallest per-core VMEM (v7x)
    if "v5" in kind or "v6" in kind:         # v5e / v6e: 1 TC, 128 MiB VMEM
        n_tc = 1
    elif "7" in kind:                        # v7x: 2 TCs, 64 MiB per TC
        n_tc = 2
    else:
        n_tc = 2 if vmem_cap <= 64 * 1024 * 1024 else 1
    return vmem_cap, n_tc


def _choose_tiles(n_pairs, S, H, itemsize, budget_bytes, *, two_tc, tile_q=None):
    """Pick (query tile, pairs-per-step, est. VMEM bytes) under the budget."""

    def est(tq, p):
        blk = 2 * p * 2 * S * H * itemsize       # double-buffered shared pair block (in)
        out = 2 * p * 2 * tq * H * itemsize      # double-buffered output tile
        bias = 4 * p * 2 * S * 4                 # row + col bias, double-buffered
        scores = 4 * p * tq * S * 4              # f32 score / prob working set
        acc = 2 * p * 2 * tq * H * 4             # f32 attended / residual intermediates
        return blk + out + bias + scores + acc

    if tile_q is not None:
        assert S % tile_q == 0 and (tile_q == S or tile_q % 8 == 0)
        tq = tile_q
    else:
        # Full S when it fits (enables the shared-QK^T reuse); otherwise a
        # 128/256-aligned tile that divides S.  If nothing divides S, stay at
        # full S (may exceed the budget; documented limitation).
        tq = S
        if est(S, 1) > budget_bytes:
            for cand in (1024, 512, 256, 128):
                if cand < S and S % cand == 0:
                    tq = cand
                    if est(cand, 1) <= budget_bytes:
                        break

    # Pack several pairs per grid step only for short sequences (amortizes the
    # ~0.35us per-step overhead) while keeping >= 2 pair steps.
    p = 1
    if S <= 128:
        for cand in (8, 4, 2):
            if (n_pairs % cand == 0 and n_pairs // cand >= 2
                    and est(tq, cand) <= budget_bytes):
                p = cand
                break

    # v7x: a (1, 1) grid idles one of the two TensorCores — split the query
    # axis when the halves stay MXU-friendly, even though that single pair
    # then loses the shared-QK^T reuse.
    if tile_q is None and two_tc and (n_pairs // p) * (S // tq) < 2:
        if tq == S and S % 256 == 0 and S >= 512:
            tq = S // 2

    return tq, p, est(tq, p)


def bert_gmn_cross_attention(hidden_states, attention_mask, *,
                             approx_recip=None, tile_q=None):
    """Pallas implementation of BertGMNStyleCrossAttention.forward
    (similarity='dotproduct').  `tile_q` forces a query-tile size (testing /
    tuning); `approx_recip=None` -> approximate reciprocal only for bf16."""
    B, S, H = hidden_states.shape
    assert B % 2 == 0, "batch must contain adjacent pairs"
    n_pairs = B // 2
    dtype = hidden_states.dtype
    itemsize = jnp.dtype(dtype).itemsize
    if approx_recip is None:
        approx_recip = bool(dtype == jnp.bfloat16)

    # (n_pairs, 2, S, H): free reshape, pairs stay adjacent as in PyTorch.
    h4 = hidden_states.reshape(n_pairs, 2, S, H)
    # Additive key bias: 0 for valid keys, -1e9 for padding.  (Fully padded
    # key sequences give a finite uniform distribution instead of the
    # reference's NaN — deliberate divergence.)
    bias = (attention_mask.astype(jnp.float32) - 1.0) * _MASK_BIAS
    bias_row = bias.reshape(n_pairs, 2, 1, S)
    bias_col = bias.reshape(n_pairs, 2, S, 1)

    vmem_cap, n_tc = _tpu_generation_info()
    if vmem_cap >= 100 * 1024 * 1024:        # v5e / v6e: 128 MiB per core
        budget, limit_cap = 96 * 1024 * 1024, 112 * 1024 * 1024
    else:                                    # v7x: 64 MiB per core
        budget, limit_cap = 40 * 1024 * 1024, 48 * 1024 * 1024

    tq, P, est_bytes = _choose_tiles(n_pairs, S, H, itemsize, budget,
                                     two_tc=(n_tc > 1), tile_q=tile_q)
    full_q = (tq == S)
    grid = (n_pairs // P, S // tq)

    # Raise v5e's 16 MiB scoped default; never exceed the per-core physical cap.
    vmem_limit = int(min(max(est_bytes * 5 // 4, 32 * 1024 * 1024), limit_cap))

    # Keep q sequential per core when the full-S pair block should stay
    # resident across query tiles; otherwise shard every axis across cores.
    if grid[1] > 1 and grid[0] >= 2:
        semantics = ("parallel", "arbitrary")
    else:
        semantics = ("parallel", "parallel")

    qk_matmuls = 1 if full_q else 2
    cost = pl.CostEstimate(
        flops=int(n_pairs * (qk_matmuls + 2) * 2 * S * S * H),
        transcendentals=int(n_pairs * 2 * S * S),
        bytes_accessed=int(2 * B * S * H * itemsize + B * S * 4),
    )

    pair_spec = pl.BlockSpec((P, 2, S, H), lambda p, q: (p, 0, 0, 0))
    out_spec = pl.BlockSpec((P, 2, tq, H), lambda p, q: (p, 0, q, 0))

    if full_q:
        kernel = _make_full_kernel(approx_recip)
        in_specs = [pair_spec,
                    pl.BlockSpec((P, 2, 1, S), lambda p, q: (p, 0, 0, 0)),
                    pl.BlockSpec((P, 2, S, 1), lambda p, q: (p, 0, 0, 0))]
        args = (h4, bias_row, bias_col)
    else:
        kernel = _make_tiled_kernel(tq, approx_recip)
        in_specs = [pair_spec,
                    pl.BlockSpec((P, 2, 1, S), lambda p, q: (p, 0, 0, 0))]
        args = (h4, bias_row)

    out4 = pl.pallas_call(
        kernel,
        out_shape=jax.ShapeDtypeStruct((n_pairs, 2, S, H), dtype),
        grid=grid,
        in_specs=in_specs,
        out_specs=out_spec,
        compiler_params=pltpu.CompilerParams(
            dimension_semantics=semantics,
            vmem_limit_bytes=vmem_limit),
        cost_estimate=cost,
    )(*args)

    return out4.reshape(B, S, H)


def _reference(hidden_states, attention_mask):
    """Pure-JAX reference mirroring the PyTorch loop."""
    B, S, H = hidden_states.shape
    outs = []
    for i in range(0, B, 2):
        a = hidden_states[i].astype(jnp.float32)
        b = hidden_states[i + 1].astype(jnp.float32)
        ma = attention_mask[i]
        mb = attention_mask[i + 1]

        sim_ab = a @ b.T
        sim_ab = jnp.where(mb[None, :] != 0, sim_ab, -jnp.inf)
        attended_a = jax.nn.softmax(sim_ab, axis=-1) @ b

        sim_ba = b @ a.T
        sim_ba = jnp.where(ma[None, :] != 0, sim_ba, -jnp.inf)
        attended_b = jax.nn.softmax(sim_ba, axis=-1) @ a

        outs.append(a + attended_a)
        outs.append(b + attended_b)
    return jnp.stack(outs).astype(hidden_states.dtype)


if __name__ == "__main__":
    key = jax.random.PRNGKey(0)
    k1, k2, k3, k4 = jax.random.split(key, 4)

    # --- case 1: tiny shapes, full-S (shared QK^T) path ---------------------
    B, S, H = 4, 8, 32   # batch of 2 pairs, seq=8, hidden=32
    hidden_states = jax.random.normal(k1, (B, S, H), dtype=jnp.float32)
    # 1 = valid token, 0 = padding; guarantee at least one valid key per seq.
    attention_mask = (jax.random.uniform(k2, (B, S)) > 0.3).astype(jnp.int32)
    attention_mask = attention_mask.at[:, 0].set(1)

    out = jax.block_until_ready(
        bert_gmn_cross_attention(hidden_states, attention_mask))
    ref = _reference(hidden_states, attention_mask)
    assert out.shape == (B, S, H)
    assert jnp.allclose(out, ref, atol=1e-4, rtol=1e-4), "full-S path mismatch"

    # --- case 2: query-tiled path (tile_q < S), still small -----------------
    B2, S2, H2 = 2, 256, 128
    h2 = jax.random.normal(k3, (B2, S2, H2), dtype=jnp.float32)
    m2 = (jax.random.uniform(k4, (B2, S2)) > 0.2).astype(jnp.int32)
    m2 = m2.at[:, 0].set(1)
    out2 = jax.block_until_ready(
        bert_gmn_cross_attention(h2, m2, tile_q=128))
    ref2 = _reference(h2, m2)
    assert out2.shape == (B2, S2, H2)
    assert jnp.allclose(out2, ref2, atol=1e-3, rtol=1e-3), "tiled path mismatch"

    print("KERNEL_OK")
</pallas_src>

<mosaic_0001>
module attributes {stable_mosaic.version = 11 : i64} {
  func.func @kernel(%arg0: i32, %arg1: i32, %arg2: memref<1x2x8x32xf32, #tpu.memory_space<vmem>>, %arg3: memref<1x2x1x8xf32, #tpu.memory_space<vmem>>, %arg4: memref<1x2x8x1xf32, #tpu.memory_space<vmem>>, %arg5: memref<1x2x8x32xf32, #tpu.memory_space<vmem>>) attributes {dimension_semantics = [#tpu.dimension_semantics<parallel>, #tpu.dimension_semantics<parallel>], iteration_bounds = array<i64: 2, 1>, scalar_prefetch = 0 : i64, scratch_operands = 0 : i64, tpu.core_type = #tpu.core_type<tc>, window_params = [{transform_indices = @transform_0, window_bounds = array<i64: 1, 2, 8, 32>}, {transform_indices = @transform_1, window_bounds = array<i64: 1, 2, 1, 8>}, {transform_indices = @transform_2, window_bounds = array<i64: 1, 2, 8, 1>}, {transform_indices = @transform_3, window_bounds = array<i64: 1, 2, 8, 32>}]} {
    %c0 = arith.constant 0 : index
    %c0_0 = arith.constant 0 : index
    %c0_1 = arith.constant 0 : index
    %c0_2 = arith.constant 0 : index
    %0 = vector.load %arg2[%c0, %c0_0, %c0_1, %c0_2] : memref<1x2x8x32xf32, #tpu.memory_space<vmem>>, vector<1x2x8x32xf32>
    %1 = vector.extract_strided_slice %0 {offsets = [0, 0, 0, 0], sizes = [1, 1, 8, 32], strides = [1, 1, 1, 1]} : vector<1x2x8x32xf32> to vector<1x1x8x32xf32>
    %2 = vector.shape_cast %1 : vector<1x1x8x32xf32> to vector<1x8x32xf32>
    %3 = vector.extract_strided_slice %0 {offsets = [0, 1, 0, 0], sizes = [1, 1, 8, 32], strides = [1, 1, 1, 1]} : vector<1x2x8x32xf32> to vector<1x1x8x32xf32>
    %4 = vector.shape_cast %3 : vector<1x1x8x32xf32> to vector<1x8x32xf32>
    %c0_3 = arith.constant 0 : index
    %c0_4 = arith.constant 0 : index
    %c0_5 = arith.constant 0 : index
    %c0_6 = arith.constant 0 : index
    %5 = vector.load %arg3[%c0_3, %c0_4, %c0_5, %c0_6] : memref<1x2x1x8xf32, #tpu.memory_space<vmem>>, vector<1x2x1x8xf32>
    %6 = vector.extract_strided_slice %5 {offsets = [0, 1, 0, 0], sizes = [1, 1, 1, 8], strides = [1, 1, 1, 1]} : vector<1x2x1x8xf32> to vector<1x1x1x8xf32>
    %7 = vector.shape_cast %6 : vector<1x1x1x8xf32> to vector<1x1x8xf32>
    %c0_7 = arith.constant 0 : index
    %c0_8 = arith.constant 0 : index
    %c0_9 = arith.constant 0 : index
    %c0_10 = arith.constant 0 : index
    %8 = vector.load %arg4[%c0_7, %c0_8, %c0_9, %c0_10] : memref<1x2x8x1xf32, #tpu.memory_space<vmem>>, vector<1x2x8x1xf32>
    %9 = vector.extract_strided_slice %8 {offsets = [0, 0, 0, 0], sizes = [1, 1, 8, 1], strides = [1, 1, 1, 1]} : vector<1x2x8x1xf32> to vector<1x1x8x1xf32>
    %10 = vector.shape_cast %9 : vector<1x1x8x1xf32> to vector<1x8x1xf32>
    "tpu.trace_start"() <{level = 10 : i32, message = "pqd,pkd->pqk"}> : () -> ()
    %cst = arith.constant dense<0.000000e+00> : vector<1x8x8xf32>
    %11 = tpu.matmul %2, %4, %cst {dimension_numbers = #tpu.dot_dimension_numbers<[2], [2], [1], [1], [0, 0, 0, 1, 1, 1], [0], [0]>} : vector<1x8x32xf32>, vector<1x8x32xf32>, vector<1x8x8xf32> -> vector<1x8x8xf32>
    "tpu.trace_stop"() : () -> ()
    %12 = vector.broadcast %7 : vector<1x1x8xf32> to vector<1x8x8xf32>
    %13 = arith.addf %11, %12 : vector<1x8x8xf32>
    %cst_11 = arith.constant dense<0xFF800000> : vector<1x8xf32>
    %14 = vector.multi_reduction <maximumf>, %13, %cst_11 [2] : vector<1x8x8xf32> to vector<1x8xf32>
    %15 = vector.shape_cast %14 : vector<1x8xf32> to vector<1x8x1xf32>
    %16 = vector.broadcast %15 : vector<1x8x1xf32> to vector<1x8x8xf32>
    %17 = arith.subf %13, %16 : vector<1x8x8xf32>
    %18 = math.exp %17 : vector<1x8x8xf32>
    %cst_12 = arith.constant dense<0.000000e+00> : vector<1x8xf32>
    %19 = vector.multi_reduction <add>, %18, %cst_12 [2] : vector<1x8x8xf32> to vector<1x8xf32>
    %20 = vector.shape_cast %19 : vector<1x8xf32> to vector<1x8x1xf32>
    %21 = tpu.reciprocal %20 : vector<1x8x1xf32> -> vector<1x8x1xf32>
    %22 = vector.broadcast %21 : vector<1x8x1xf32> to vector<1x8x8xf32>
    %23 = arith.mulf %18, %22 : vector<1x8x8xf32>
    %24 = vector.broadcast %10 : vector<1x8x1xf32> to vector<1x8x8xf32>
    %25 = arith.addf %11, %24 : vector<1x8x8xf32>
    %cst_13 = arith.constant dense<0xFF800000> : vector<1x8xf32>
    %26 = vector.multi_reduction <maximumf>, %25, %cst_13 [1] : vector<1x8x8xf32> to vector<1x8xf32>
    %27 = vector.shape_cast %26 : vector<1x8xf32> to vector<1x1x8xf32>
    %28 = vector.broadcast %27 : vector<1x1x8xf32> to vector<1x8x8xf32>
    %29 = arith.subf %25, %28 : vector<1x8x8xf32>
    %30 = math.exp %29 : vector<1x8x8xf32>
    %cst_14 = arith.constant dense<0.000000e+00> : vector<1x8xf32>
    %31 = vector.multi_reduction <add>, %30, %cst_14 [1] : vector<1x8x8xf32> to vector<1x8xf32>
    %32 = vector.shape_cast %31 : vector<1x8xf32> to vector<1x1x8xf32>
    %33 = tpu.reciprocal %32 : vector<1x1x8xf32> -> vector<1x1x8xf32>
    %34 = vector.broadcast %33 : vector<1x1x8xf32> to vector<1x8x8xf32>
    %35 = arith.mulf %30, %34 : vector<1x8x8xf32>
    %36 = tpu.transpose %35, [0, 2, 1] : vector<1x8x8xf32> -> vector<1x8x8xf32>
    "tpu.trace_start"() <{level = 10 : i32, message = "pqk,pkd->pqd"}> : () -> ()
    %cst_15 = arith.constant dense<0.000000e+00> : vector<1x8x32xf32>
    %37 = tpu.matmul %23, %4, %cst_15 {dimension_numbers = #tpu.dot_dimension_numbers<[2], [1], [1], [2], [0, 0, 0, 1, 1, 2], [0], [0]>} : vector<1x8x8xf32>, vector<1x8x32xf32>, vector<1x8x32xf32> -> vector<1x8x32xf32>
    %cst_16 = arith.constant dense<0.000000e+00> : vector<1x8x32xf32>
    %38 = tpu.matmul %36, %2, %cst_16 {dimension_numbers = #tpu.dot_dimension_numbers<[2], [1], [1], [2], [0, 0, 0, 1, 1, 2], [0], [0]>} : vector<1x8x8xf32>, vector<1x8x32xf32>, vector<1x8x32xf32> -> vector<1x8x32xf32>
    "tpu.trace_stop"() : () -> ()
    %39 = arith.addf %2, %37 : vector<1x8x32xf32>
    %c0_17 = arith.constant 0 : index
    %c0_18 = arith.constant 0 : index
    %c0_19 = arith.constant 0 : index
    %c0_20 = arith.constant 0 : index
    %40 = vector.load %arg5[%c0_17, %c0_18, %c0_19, %c0_20] : memref<1x2x8x32xf32, #tpu.memory_space<vmem>>, vector<1x1x8x32xf32>
    %41 = vector.shape_cast %40 : vector<1x1x8x32xf32> to vector<1x8x32xf32>
    %42 = vector.shape_cast %39 : vector<1x8x32xf32> to vector<1x1x8x32xf32>
    tpu.vector_store %arg5[%c0_17, %c0_18, %c0_19, %c0_20], %42 {strides = array<i32>} : memref<1x2x8x32xf32, #tpu.memory_space<vmem>>, vector<1x1x8x32xf32>,
    %43 = arith.addf %4, %38 : vector<1x8x32xf32>
    %c0_21 = arith.constant 0 : index
    %c1 = arith.constant 1 : index
    %c0_22 = arith.constant 0 : index
    %c0_23 = arith.constant 0 : index
    %44 = vector.load %arg5[%c0_21, %c1, %c0_22, %c0_23] : memref<1x2x8x32xf32, #tpu.memory_space<vmem>>, vector<1x1x8x32xf32>
    %45 = vector.shape_cast %44 : vector<1x1x8x32xf32> to vector<1x8x32xf32>
    %46 = vector.shape_cast %43 : vector<1x8x32xf32> to vector<1x1x8x32xf32>
    tpu.vector_store %arg5[%c0_21, %c1, %c0_22, %c0_23], %46 {strides = array<i32>} : memref<1x2x8x32xf32, #tpu.memory_space<vmem>>, vector<1x1x8x32xf32>,
    return
  }
  func.func @transform_0(%arg0: i32, %arg1: i32) -> (i32, i32, i32, i32) {
    %c0_i32 = arith.constant 0 : i32
    %c0_i32_0 = arith.constant 0 : i32
    %c0_i32_1 = arith.constant 0 : i32
    %c0_i32_2 = arith.constant 0 : i32
    return %arg0, %c0_i32, %c0_i32_0, %c0_i32_1 : i32, i32, i32, i32
  }
  func.func @transform_1(%arg0: i32, %arg1: i32) -> (i32, i32, i32, i32) {
    %c0_i32 = arith.constant 0 : i32
    %c0_i32_0 = arith.constant 0 : i32
    %c0_i32_1 = arith.constant 0 : i32
    %c0_i32_2 = arith.constant 0 : i32
    return %arg0, %c0_i32, %c0_i32_0, %c0_i32_1 : i32, i32, i32, i32
  }
  func.func @transform_2(%arg0: i32, %arg1: i32) -> (i32, i32, i32, i32) {
    %c0_i32 = arith.constant 0 : i32
    %c0_i32_0 = arith.constant 0 : i32
    %c0_i32_1 = arith.constant 0 : i32
    %c0_i32_2 = arith.constant 0 : i32
    return %arg0, %c0_i32, %c0_i32_0, %c0_i32_1 : i32, i32, i32, i32
  }
  func.func @transform_3(%arg0: i32, %arg1: i32) -> (i32, i32, i32, i32) {
    %c0_i32 = arith.constant 0 : i32
    %c0_i32_0 = arith.constant 0 : i32
    %c0_i32_1 = arith.constant 0 : i32
    return %arg0, %c0_i32, %arg1, %c0_i32_0 : i32, i32, i32, i32
  }
}

</mosaic_0001>

<bundles_post_ra>
// kernel: tpu_custom_call.1
= control target key start
LH: loop header
LB: loop body
LE: loop exit
PB: predicated region body
PF: predicated region fallthrough
CT: control target
= control target key end

     0   :  { %8 = vsyncpa [#allocation3], 0  ;;  %s1005_s0 = inlined_call_operand.vmem [shape: f32[2,2,8,32], index: 0, kind: input, shape index: {}]   ;;  %s1006_s1 = inlined_call_operand.vmem [shape: f32[2,2,1,8], index: 1, kind: input, shape index: {}]   ;;  %s1007_s2 = inlined_call_operand.vmem [shape: f32[2,2,8,1], index: 2, kind: input, shape index: {}]   ;;  %s1008_s3 = inlined_call_operand.hbm [shape: f32[2,2,8,32], index: 3, kind: output, shape index: {}]  }
   0x1   :  { %10 = vsyncpa [#allocation3 + $0x1], 0  ;;  %s860_s12 = smov 0   ;;  %s862_s13 = smov 0  }
   0x2   :  { %s864_s14 = smov 0   ;;  %s866_s15 = smov 0  }
   0x3   :  { %s868_s16 = smov 0   ;;  %s870_s17 = smov 0  }
   0x4 LB: > { %s639_s18 = sadd.s32 4294967295, %s832_s17   ;;  %s640_s19 = sadd.s32 4294967294, %s832_s17   ;;  %s832_s17 = sphi %s870_s17, %s16_s17   ;;  %s828_s16 = sphi %s868_s16, %s1015_s16   ;;  %s824_s15 = sphi %s866_s15, %s1014_s15   ;;  %s820_s14 = sphi %s864_s14, %s1013_s14   ;;  %s816_s13 = sphi %s862_s13, %s1012_s13   ;;  %s812_s12 = sphi %s860_s12, %s1011_s12  }
   0x5   : > { %s28_s20 = sadd.s32 1, %s828_s16  ;;  %s115_s21 = sadd.s32 1, %s820_s14 }
   0x6   : > { %p30_p0 = scmp.ge.s32.totalorder %s28_s20, 2  ;;  %p125_p1 = scmp.ne.s32.totalorder %s820_s14, %s816_s13 }
   0x7   : > { %p126_p2 = scmp.eq.s32.totalorder %s639_s18, 1  ;;  %p131_p3 = scmp.ne.s32.totalorder %s816_s13, %s812_s12 }
   0x8   : > { %s1017_s20 = smov (%p30_p0, %s28_s20), 0  ;;  %p132_p5 = scmp.eq.s32.totalorder %s640_s19, 1 }
   0x9   : > { %p900_p4 = por %p126_p2, %p125_p1  ;;  %s110_s23 = ssub.s32 %s828_s16, %s1017_s20 }
   0xa   : > { %p643_p6 = scmp.ge.s32.totalorder %s832_s17, 1  ;;  %p113_p7 = scmp.eq.s32.totalorder %s110_s23, 0 }
   0xb   : > { %p907_p8 = por %p132_p5, %p131_p3  ;;  %p173_p9 = scmp.lt.s32.totalorder %s832_s17, 3 }
   0xc   : > { %s913_s25 = scalar_select %p113_p7, %s820_s14, %s115_s21  }
   0xd   : > { %p174_p10 = pnand %p643_p6, %p173_p9 }
   0xe   : > { %p206_p11 = scmp.lt.s32.totalorder (!%p174_p10), %s824_s15, 1  ;;  %v834_v0 = vmov (!%p174_p10), 0.0   ;;  %vm835_vm0 = vmmov (!%p174_p10), 0   ;;  %vm224_vm1 = vcmask (!%p174_p10), 261120   ;;  %v836_v3 = vmov (!%p174_p10), 0   ;;  %s203_s11 = sand.u32 (!%p174_p10), 1, %s816_s13  }
   0xf   : > { %177 = sbr.rel (%p174_p10) target bundleno = 812 (0x32c), region = 32  ;;  %670 = vmatprep.subr.mxu0 (!%p174_p10), %v834_v0  ;;  %672 = vmatprep.mubr.msk.f32.mxu0 (!%p174_p10), %vm835_vm0, %v834_v0  ;;  %vm308_vm2 = vcmask (!%p174_p10), 64512   ;;  %s644_s18 = sshll.u32 (!%p174_p10), %s203_s11, 4 }
  0x10   : > { %675 = vmatprep.subr.mxu1 (!%p174_p10), %v834_v0  ;;  %677 = vmatprep.mubr.msk.f32.mxu1 (!%p174_p10), %vm835_vm0, %v834_v0  ;;  %s205_s19 = scalar_lea.vmem (!%p174_p10), [#allocation2], %s644_s18  ;;  %s663_s23 = sshll.u32 (!%p174_p10), %s824_s15, 8 }
  0x11   : > { %745 = vset.pattern.permute.xlu0 (!%p174_p10), %v836_v3  ;;  %s543_s21 = sshll.u32 (!%p174_p10), %s205_s19, 4  ;;  %s955_s28 = scalar_lea.hbm (!%p174_p10), %s1008_s3, %s663_s23  ;;  %s950_s21 = int_to_ptr.vmem [resolvable:$true] %s543_s21 }
  0x12   : > { %s959_s29 = scalar_lea.sflag (!%p174_p10), [#allocation3], %s203_s11 }
  0x16   : > { %s207_s26 = scalar_select %p206_p11, %s824_s15, 1 }
  0x17   : > { %s837_s15 = smov [#allocation2]  }
  0x18   : > { %s661_s27 = sshll.u32 %s207_s26, 4  ;;  %s647_s4 = sshll.u32 %s207_s26, 1 }
  0x19   : > { %s210_s30 = scalar_lea.vmem %s1005_s0, %s661_s27  ;;  %s214_s7 = scalar_lea.vmem %s1006_s1, %s647_s4 }
  0x1a   : > { %v926_v1 = vld [vmem:[%s210_s30 + $0x8] sm:$0xff]  ;;  %v220_v2 = vld [vmem:[%s210_s30] sm:$0xff]  ;;  %s219_s10 = scalar_lea.vmem %s1007_s2, %s661_s27  ;;  %s754_s30 = scalar_lea.vmem %s950_s21, 256 }
  0x1b   : > { %671 = vmatpush3.xpose.msk.msra.mxu0 %vm224_vm1, %v926_v1  ;;  %676 = vmatpush3.msra.mxu1 %v926_v1  ;;  %v652_v4 = vld [vmem:[%s214_s7 + $0x1] ss:$0 sm:$0xff]  ;;  %p755_p12 = scmp.ne.s32.totalorder %s950_s21, %s754_s30  ;;  %s758_s4 = sshll.u32 %s837_s15, 4  ;;  %s759_s4 = int_to_ptr.vmem [resolvable:$false] %s758_s4 }
  0x1c   : > { %680 = vmatprep.subr.mxu1 %v834_v0  ;;  %v223_v9 = vld [vmem:[%s219_s10] sm:$0xff]  ;;  %s760_s5 = scalar_lea.vmem %s759_s4, 512  ;;  %p761_p1 = scmp.lt.s32.totalorder %s950_s21, %s759_s4 }
  0x1d   : > { %p756_p13 = pnand %p755_p12, %p900_p4  ;;  %p762_p2 = scmp.lt.s32.totalorder %s760_s5, %s754_s30 }
  0x1e   : > { %673 = vmatmul.mubr.msk.f32.vlgmr.msra.gmra.mrb[0].mxu0 %vm224_vm1, %v220_v2 }
  0x1f   : > { %p757_p0 = pneg %p756_p13  ;;  %p763_p3 = por %p762_p2, %p761_p1 }
  0x21   : > { %p764_p5 = pnand %p763_p3, %p757_p0 }
  0xf1   : > { %v297_v5 = vpop.f32.mrb[0].mxu0 }
  0xf2   : > { %v674_v6 = vpop.f32.mrb[1].mxu0  ;;  %v307_v7 = vadd.f32 %v652_v4, %v297_v5 }
  0xf4   : > { %v309_v8 = vsel %vm308_vm2, %v307_v7, -inf }
  0xf5   : > { %310 = vmax.xlane.f32.xlu0 %v309_v8 }
 0x10b   : > { %322 = vperm.xlu0 %745, %v223_v9  }
 0x182   : > { %v311_v10 = vpop.xlane.xlu0 %310 }
 0x183   : > { %v312_v11 = vsub.f32 %v307_v7, %v311_v10 }
 0x185   : > { %v313_v12 = vmul.f32 1.442695, %v312_v11 }
 0x187   : > { %746 = vpow2.f32 %v313_v12 }
 0x18a   : > { %v323_v13 = vpop.permute.xlu0 %322 }
 0x18b   : > { %v325_v14 = vadd.f32 %v323_v13, %v297_v5 }
 0x18d   : > { %v326_v15 = vsel %vm308_vm2, %v325_v14, -inf }
 0x18e   : > { %v327_v16 = vrot.slane %v326_v15, 4 }
 0x190   : > { %v328_v17 = vmax.f32 %v326_v15, %v327_v16 }
 0x191   : > { %v747_v18 = vpop.eup %746 }
 0x192   : > { %v329_v19 = vrot.slane %v328_v17, 2  ;;  %v315_v20 = vsel %vm308_vm2, %v747_v18, 0.0 }
 0x193   : > { %316 = vadd.xlane.f32.xlu1 %v315_v20 }
 0x194   : > { %v330_v21 = vmax.f32 %v328_v17, %v329_v19 }
 0x196   : > { %v331_v22 = vrot.slane %v330_v21, 1 }
 0x198   : > { %v332_v23 = vmax.f32 %v330_v21, %v331_v22 }
 0x19a   : > { %v333_v24 = vsub.f32 %v325_v14, %v332_v23 }
 0x19c   : > { %v334_v25 = vmul.f32 1.442695, %v333_v24 }
 0x19e   : > { %748 = vpow2.f32 %v334_v25 }
 0x1a8   : > { %v749_v26 = vpop.eup %748 }
 0x1a9   : > { %v336_v27 = vsel %vm308_vm2, %v749_v26, 0.0 }
 0x1aa   : > { %v337_v28 = vrot.slane %v336_v27, 4 }
 0x1ac   : > { %v338_v29 = vadd.f32 %v337_v28, %v336_v27 }
 0x1ae   : > { %v339_v30 = vrot.slane %v338_v29, 2 }
 0x1b0   : > { %v340_v31 = vadd.f32 %v339_v30, %v338_v29 }
 0x1b2   : > { %v341_v32 = vrot.slane %v340_v31, 1 }
 0x1b4   : > { %v342_v33 = vadd.f32 %v341_v32, %v340_v31 }
 0x1b6   : > { %750 = vrcp.f32 %v342_v33 }
 0x1c0   : > { %v751_v34 = vpop.eup %750 }
 0x1c1   : > { %v344_v35 = vmul.f32 %v751_v34, %v749_v26 }
 0x1c6   : > { %345 = vxpose.xlu1.b32.start.end [1/1] (short) (narrow) %v344_v35, 8 }
 0x220   : > { %v317_v36 = vpop.xlane.xlu1 %316 }
 0x221   : > { %752 = vrcp.f32 %v317_v36 }
 0x22b   : > { %v753_v37 = vpop.eup %752 }
 0x22c   : > { %v319_v38 = vmul.f32 %v753_v37, %v747_v18 }
 0x22e   : > { %678 = vmatmul.mubr.msk.f32.vlgmr.msra.gmra.mrb[0].mxu1 %vm308_vm2, %v319_v38 }
 0x22f   : > { %681 = vmatpush3.msra.mxu1 %v220_v2  ;;  %682 = vmatprep.mubr.msk.f32.mxu1 %vm835_vm0, %v834_v0 }
 0x246   : > { %v361_v39 = vpop.trf.xlu1 }
 0x247   : > { %683 = vmatmul.mubr.msk.f32.vlgmr.msra.gmra.mrb[2].mxu1 %vm308_vm2, %v361_v39 }
 0x301   : > { %v446_v40 = vpop.f32.mrb[0].mxu1 }
 0x302   : > { %v523_v41 = vadd.f32 %v446_v40, %v220_v2  ;;  %v679_v42 = vpop.f32.mrb[1].mxu1 }
 0x304   : > { %524 = vst.msk [vmem:[%s205_s19] sm:$0xff] %vm224_vm1, %v523_v41 }
 0x31a   : > { %v519_v43 = vpop.f32.mrb[2].mxu1 }
 0x31b   : > { %v525_v44 = vadd.f32 %v519_v43, %v926_v1  ;;  %v684_v45 = vpop.f32.mrb[3].mxu1 }
 0x31d   : > { %655 = vst.msk [vmem:[%s205_s19 + $0x8] sm:$0xff] %vm224_vm1, %v525_v44 }
 0x31e   : > { %767 = shalt.err (!%p764_p5)
}
 0x31f   : > { %s768_s6 = scalar_lea.hbm %s955_s28, 256  ;;  %s772_s9 = scalar_lea.hbm %s1008_s3, 512 }
 0x320   : > { %p769_p6 = scmp.ne.s32.totalorder %s955_s28, %s768_s6  ;;  %p773_p10 = scmp.lt.u32.totalorder %s955_s28, %s1008_s3 }
 0x321   : > { %p774_p11 = scmp.lt.u32.totalorder %s772_s9, %s768_s6  ;;  %p776_p13 = scmp.lt.u32.totalorder %s768_s6, %s955_s28 }
 0x322   : > { %p770_p7 = pnand %p769_p6, %p900_p4 }
 0x323   : > { %p775_p12 = por %p774_p11, %p773_p10 }
 0x324   : > { %p771_p9 = pneg %p770_p7 }
 0x325   : > { %p777_p0 = por %p776_p13, %p775_p12 }
 0x327   : > { %p778_p1 = pnand %p777_p0, %p771_p9 }
 0x329   : > { %781 = shalt.err (!%p778_p1)
}
 0x32a   : > { %s838_s18 = smov 128   ;;  %s839_s19 = smov 8  }
 0x32b   : > { %685 = dma.vmem_to_hbm [thread:$0]  (%p900_p4), %s950_s21, 256, %s955_s28, %s959_s29, %s838_s18, %s838_s18, %s839_s19  }
 0x32c PF: > { %p691_p2 = scmp.ge.s32.totalorder %s832_s17, 2  ;;  %s558_s23 = sand.u32 1, %s812_s12  }
 0x32d   : > { %s559_s26 = scalar_lea.sflag [#allocation3], %s558_s23 }
 0x32e   : > { %p688_p3 = pnand %p691_p2, %p907_p8 }
 0x330   : > { %807 = dma.done.wait (!%p688_p3), %s559_s26, 256  }
 0x331   : > { %809 = vsyncadd (!%p688_p3), %s559_s26, 4294967040  ;;  %s16_s17 = sadd.s32 1, %s832_s17   ;;  %s1011_s12 = smov %s816_s13 }
 0x332   : > { %p13_p5 = scmp.ge.s32.totalorder %s16_s17, 4   ;;  %s1012_s13 = smov %s820_s14 }
 0x333   : > { %s1013_s14 = smov %s913_s25  ;;  %s1014_s15 = smov %s828_s16 }
 0x334   : > { %s1015_s16 = smov %s1017_s20  ;;  %15 = sbr.rel (!%p13_p5) target bundleno = 4 (0x4), region = 74 }
 0x33b   :  { %564 = vsyncpa [#allocation3], 1 }
 0x33c   :  { %566 = vsyncpa [#allocation3 + $0x1], 1 }

</bundles_post_ra>
